<compile_context>
chip_gen: v7x
topology: tpu7x:2x2x1
jax: 0.10.0
libtpu: 0.0.40
codegen_flags: <defaults>
</compile_context>

<pallas_src>
import functools

import jax
import jax.numpy as jnp
from jax import lax
from jax.experimental import pallas as pl
from jax.experimental.pallas import tpu as pltpu


def _focal_loss_kernel(logits_ref, targets_ref, out_ref, *, alpha, gamma, n_total):
    # logits_ref : (T, C) native-dtype VMEM block of logits
    # targets_ref: (T, 1) i32 VMEM block of class indices
    # out_ref    : (1, 8, 128) f32 VMEM block; this tile's partial focal sum,
    #              broadcast into one lane-dense vreg (reduced in the wrapper)
    i = pl.program_id(0)

    logits = logits_ref[...].astype(jnp.float32)            # (T, C)
    tgt = targets_ref[...]                                   # (T, 1) int32
    t, c = logits.shape

    # One-hot selection of the target logit via iota compare (no gather).
    col = lax.broadcasted_iota(jnp.int32, (t, c), 1)         # (T, C)
    onehot = col == tgt                                      # (T,1) -> (T,C)

    # Numerically-stable log-sum-exp along the class (lane) axis.
    m = jnp.max(logits, axis=-1, keepdims=True)              # (T, 1)
    sum_exp = jnp.sum(jnp.exp(logits - m), axis=-1, keepdims=True)
    lse = m + jnp.log(sum_exp)                               # (T, 1)
    picked = jnp.sum(jnp.where(onehot, logits, 0.0), axis=-1, keepdims=True)

    ce = lse - picked                                        # (T, 1) per-sample CE
    pt = jnp.exp(-ce)                                        # (T, 1)
    one_minus_pt = 1.0 - pt

    # Integer gamma -> plain VPU multiplies (EUP slot is already busy with exp).
    g = float(gamma)
    if g.is_integer() and 0.0 <= g <= 8.0:
        w = jnp.ones_like(one_minus_pt)
        for _ in range(int(g)):
            w = w * one_minus_pt
    else:
        # clamp against tiny negative bases from fp rounding before pow
        w = jnp.maximum(one_minus_pt, 0.0) ** g

    focal = alpha * w * ce                                   # (T, 1)

    # Ragged last tile: mask only the cheap (T,1) focal vector. Padded-row
    # garbage (even NaN/inf) cannot leak into valid rows because the only
    # cross-row op (the axis-0 sum) happens after this mask.
    if n_total % t != 0:
        row = lax.broadcasted_iota(jnp.int32, (t, 1), 0)     # (T, 1)
        valid = (i * t + row) < n_total                      # (T, 1) bool
        focal = jnp.where(valid, focal, 0.0)

    part = jnp.sum(focal, axis=0, keepdims=True)             # (1, 1)
    out_ref[...] = jnp.broadcast_to(part[None], (1, 8, 128))


def _tile_and_vmem(n, c, itemsize):
    """Generation-aware tile size (sublanes) + vmem_limit_bytes."""
    try:
        vmem_cap = getattr(pltpu.get_tpu_info(), "vmem_capacity_bytes", None)
    except Exception:  # pragma: no cover - info query unavailable
        vmem_cap = None
    if vmem_cap is None:
        vmem_cap = 64 * 1024 * 1024  # conservative: assume v7x-sized VMEM

    if vmem_cap <= 64 * 1024 * 1024:
        # v7x-class: 64 MiB physical VMEM.
        buf_budget = 5 * 1024 * 1024
        vmem_limit = 48 * 1024 * 1024
    else:
        # v5e / v6e: 128 MiB physical VMEM (v5e scoped default is only 16 MiB,
        # so the explicit limit matters there).
        buf_budget = 10 * 1024 * 1024
        vmem_limit = 64 * 1024 * 1024

    # Per-row VMEM in one pipeline buffer: logits row + lane-padded (.,1) i32
    # targets row (pads to 128 lanes * 4 B regardless of the 4 B payload).
    per_row = c * itemsize + 128 * 4
    t = buf_budget // max(1, per_row)
    t = max(8, min(8192, int(t)))
    t = (t // 8) * 8
    if t >= n:
        return n, vmem_limit     # full array along N (always legal block dim)
    return t, vmem_limit


def focal_loss(inputs, targets, alpha=0.5, gamma=2.0, tile_n=None):
    """inputs: (N, C) logits in native dtype; targets: (N,) int class indices."""
    n, c = inputs.shape
    targets2d = targets.reshape(n, 1).astype(jnp.int32)

    auto_tile, vmem_limit = _tile_and_vmem(n, c, inputs.dtype.itemsize)
    if tile_n is None:
        tile_n = auto_tile
    else:
        tile_n = int(tile_n)
        tile_n = n if tile_n >= n else max(8, (tile_n // 8) * 8)

    n_tiles = pl.cdiv(n, tile_n)

    partials = pl.pallas_call(
        functools.partial(
            _focal_loss_kernel,
            alpha=float(alpha), gamma=float(gamma), n_total=n),
        out_shape=jax.ShapeDtypeStruct((n_tiles, 8, 128), jnp.float32),
        grid=(n_tiles,),
        in_specs=[
            pl.BlockSpec((tile_n, c), lambda i: (i, 0)),   # streamed logits tiles
            pl.BlockSpec((tile_n, 1), lambda i: (i, 0)),   # matching targets tiles
        ],
        out_specs=pl.BlockSpec((1, 8, 128), lambda i: (i, 0, 0)),  # per-tile partials
        compiler_params=pltpu.CompilerParams(
            dimension_semantics=("parallel",),             # no carried state
            vmem_limit_bytes=vmem_limit,
        ),
    )(inputs, targets2d)

    # Final mean over the per-tile partial sums (tiny) in the wrapper.
    return jnp.sum(partials[:, 0, 0]) / jnp.float32(n)


def _focal_loss_ref(inputs, targets, alpha=0.5, gamma=2.0):
    # pure-JAX reference mirroring F.cross_entropy(reduction='none')
    logp = jax.nn.log_softmax(inputs.astype(jnp.float32), axis=-1)
    ce = -jnp.take_along_axis(logp, targets[:, None].astype(jnp.int32), axis=-1)[:, 0]
    pt = jnp.exp(-ce)
    return jnp.mean(alpha * (1.0 - pt) ** gamma * ce)


if __name__ == "__main__":
    key = jax.random.PRNGKey(0)
    k1, k2, k3, k4 = jax.random.split(key, 4)

    # --- small case (matches the module's simplest use): 8 samples, 32 classes
    N1, C1 = 8, 32
    x1 = jax.random.normal(k1, (N1, C1), dtype=jnp.float32)
    t1 = jax.random.randint(k2, (N1,), 0, C1, dtype=jnp.int32)
    loss1 = focal_loss(x1, t1, alpha=0.5, gamma=2.0)
    jax.block_until_ready(loss1)
    ref1 = _focal_loss_ref(x1, t1, alpha=0.5, gamma=2.0)
    assert jnp.allclose(loss1, ref1, atol=1e-5, rtol=1e-4), (loss1, ref1)

    # --- tiled case: exercises multi-tile parallel partials, ragged last tile
    #     masking, and native bf16 inputs (cast to f32 inside the kernel)
    N2, C2 = 300, 256
    x2 = jax.random.normal(k3, (N2, C2), dtype=jnp.float32).astype(jnp.bfloat16)
    t2 = jax.random.randint(k4, (N2,), 0, C2, dtype=jnp.int32)
    loss2 = focal_loss(x2, t2, alpha=0.25, gamma=2.0, tile_n=128)
    jax.block_until_ready(loss2)
    ref2 = _focal_loss_ref(x2, t2, alpha=0.25, gamma=2.0)
    assert jnp.allclose(loss2, ref2, atol=1e-5, rtol=1e-4), (loss2, ref2)

    print("KERNEL_OK")
</pallas_src>

<mosaic_0001>
module attributes {stable_mosaic.version = 11 : i64} {
  func.func @_focal_loss_kernel(%arg0: i32, %arg1: memref<8x32xf32, #tpu.memory_space<vmem>>, %arg2: memref<8x1xi32, #tpu.memory_space<vmem>>, %arg3: memref<1x8x128xf32, #tpu.memory_space<vmem>>) attributes {dimension_semantics = [#tpu.dimension_semantics<parallel>], iteration_bounds = array<i64: 1>, scalar_prefetch = 0 : i64, scratch_operands = 0 : i64, tpu.core_type = #tpu.core_type<tc>, window_params = [{transform_indices = @transform_0, window_bounds = array<i64: 8, 32>}, {transform_indices = @transform_1, window_bounds = array<i64: 8, 1>}, {transform_indices = @transform_2, window_bounds = array<i64: 1, 8, 128>}]} {
    %c0 = arith.constant 0 : index
    %c0_0 = arith.constant 0 : index
    %0 = vector.load %arg1[%c0, %c0_0] : memref<8x32xf32, #tpu.memory_space<vmem>>, vector<8x32xf32>
    %c0_1 = arith.constant 0 : index
    %c0_2 = arith.constant 0 : index
    %1 = vector.load %arg2[%c0_1, %c0_2] : memref<8x1xi32, #tpu.memory_space<vmem>>, vector<8x1xi32>
    %2 = tpu.iota {dimensions = array<i32: 1>} : vector<8x32xi32>
    %3 = vector.broadcast %1 : vector<8x1xi32> to vector<8x32xi32>
    %4 = arith.cmpi eq, %2, %3 : vector<8x32xi32>
    %cst = arith.constant dense<0xFF800000> : vector<8xf32>
    %5 = vector.multi_reduction <maximumf>, %0, %cst [1] : vector<8x32xf32> to vector<8xf32>
    %6 = vector.shape_cast %5 : vector<8xf32> to vector<8x1xf32>
    %7 = vector.broadcast %6 : vector<8x1xf32> to vector<8x32xf32>
    %8 = arith.subf %0, %7 : vector<8x32xf32>
    %9 = math.exp %8 : vector<8x32xf32>
    %cst_3 = arith.constant dense<0.000000e+00> : vector<8xf32>
    %10 = vector.multi_reduction <add>, %9, %cst_3 [1] : vector<8x32xf32> to vector<8xf32>
    %11 = vector.shape_cast %10 : vector<8xf32> to vector<8x1xf32>
    %12 = math.log %11 : vector<8x1xf32>
    %13 = arith.addf %6, %12 : vector<8x1xf32>
    %cst_4 = arith.constant 0.000000e+00 : f32
    %14 = vector.broadcast %cst_4 : f32 to vector<8x32xf32>
    %15 = arith.select %4, %0, %14 : vector<8x32xi1>, vector<8x32xf32>
    %cst_5 = arith.constant dense<0.000000e+00> : vector<8xf32>
    %16 = vector.multi_reduction <add>, %15, %cst_5 [1] : vector<8x32xf32> to vector<8xf32>
    %17 = vector.shape_cast %16 : vector<8xf32> to vector<8x1xf32>
    %18 = arith.subf %13, %17 : vector<8x1xf32>
    %cst_6 = arith.constant 0.000000e+00 : f32
    %19 = vector.broadcast %cst_6 : f32 to vector<8x1xf32>
    %20 = arith.subf %19, %18 : vector<8x1xf32>
    %21 = math.exp %20 : vector<8x1xf32>
    %cst_7 = arith.constant 1.000000e+00 : f32
    %22 = vector.broadcast %cst_7 : f32 to vector<8x1xf32>
    %23 = arith.subf %22, %21 : vector<8x1xf32>
    %cst_8 = arith.constant 1.000000e+00 : f32
    %24 = vector.broadcast %cst_8 : f32 to vector<8x1xf32>
    %25 = arith.mulf %24, %23 : vector<8x1xf32>
    %26 = arith.mulf %25, %23 : vector<8x1xf32>
    %cst_9 = arith.constant 5.000000e-01 : f32
    %27 = vector.broadcast %cst_9 : f32 to vector<8x1xf32>
    %28 = arith.mulf %27, %26 : vector<8x1xf32>
    %29 = arith.mulf %28, %18 : vector<8x1xf32>
    %cst_10 = arith.constant dense<0.000000e+00> : vector<1xf32>
    %30 = vector.multi_reduction <add>, %29, %cst_10 [0] : vector<8x1xf32> to vector<1xf32>
    %31 = vector.shape_cast %30 : vector<1xf32> to vector<1x1xf32>
    %32 = vector.shape_cast %31 : vector<1x1xf32> to vector<1x1x1xf32>
    %33 = vector.shape_cast %32 : vector<1x1x1xf32> to vector<1x1x1xf32>
    %34 = vector.broadcast %33 : vector<1x1x1xf32> to vector<1x8x128xf32>
    %c0_11 = arith.constant 0 : index
    %c0_12 = arith.constant 0 : index
    %c0_13 = arith.constant 0 : index
    %35 = vector.load %arg3[%c0_11, %c0_12, %c0_13] : memref<1x8x128xf32, #tpu.memory_space<vmem>>, vector<1x8x128xf32>
    tpu.vector_store %arg3[%c0_11, %c0_12, %c0_13], %34 {strides = array<i32>} : memref<1x8x128xf32, #tpu.memory_space<vmem>>, vector<1x8x128xf32>,
    return
  }
  func.func @transform_0(%arg0: i32) -> (i32, i32) {
    %c0_i32 = arith.constant 0 : i32
    %c0_i32_0 = arith.constant 0 : i32
    return %arg0, %c0_i32 : i32, i32
  }
  func.func @transform_1(%arg0: i32) -> (i32, i32) {
    %c0_i32 = arith.constant 0 : i32
    %c0_i32_0 = arith.constant 0 : i32
    return %arg0, %c0_i32 : i32, i32
  }
  func.func @transform_2(%arg0: i32) -> (i32, i32, i32) {
    %c0_i32 = arith.constant 0 : i32
    %c0_i32_0 = arith.constant 0 : i32
    %c0_i32_1 = arith.constant 0 : i32
    return %arg0, %c0_i32, %c0_i32_0 : i32, i32, i32
  }
}

</mosaic_0001>

<bundles_post_ra>
// kernel: tpu_custom_call.1
= control target key start
LH: loop header
LB: loop body
LE: loop exit
PB: predicated region body
PF: predicated region fallthrough
CT: control target
= control target key end

     0   :  { %vm20_vm0 = vcmask 261120   ;;  %s137_s0 = inlined_call_operand.vmem [shape: f32[8,32], index: 0, kind: input, shape index: {}]   ;;  %s138_s1 = inlined_call_operand.vmem [shape: s32[8,1], index: 1, kind: input, shape index: {}]   ;;  %s139_s2 = inlined_call_operand.hbm [shape: f32[1,8,128], index: 2, kind: output, shape index: {}]  }
   0x1   :  { %v12_v0 = vld [vmem:[%s137_s0] sm:$0xff] }
   0x2   :  { %7 = vsyncpa [#allocation3], 0  ;;  %v21_v1 = vsel %vm20_vm0, %v12_v0, -inf  ;;  %v99_v2 = vmov 0   ;;  %v13_v3 = vld [vmem:[%s138_s1] sm:$0xff]  ;;  %v14_v7 = vlaneseq  ;;  %s100_s0 = smov [#allocation2]  }
   0x3   :  { %68 = vset.pattern.permute.xlu0 %v99_v2  ;;  %s58_s1 = sshll.u32 %s100_s0, 4  ;;  %s59_s1 = int_to_ptr.vmem [resolvable:$true] %s58_s1 }
   0x4   :  { %22 = vmax.xlane.f32.xlu0 %v21_v1  ;;  %v15_v8 = vand.u32 127, %v14_v7  ;;  %s75_s13 = scalar_lea.vmem %s59_s1, 128  ;;  %p80_p1 = scmp.lt.s32.totalorder %s59_s1, %s59_s1 }
   0x5   :  { %p76_p0 = scmp.ne.s32.totalorder %s59_s1, %s75_s13  ;;  %p81_p2 = scmp.lt.s32.totalorder %s75_s13, %s75_s13 }
   0x7   :  { %p82_p3 = por %p81_p2, %p80_p1 }
   0x9   :  { %p83_p4 = pnand %p82_p3, %p76_p0 }
  0x1a   :  { %17 = vperm.xlu0 %68, %v13_v3  }
  0x91   :  { %v23_v4 = vpop.xlane.xlu0 %22 }
  0x92   :  { %v24_v5 = vsub.f32 %v12_v0, %v23_v4 }
  0x94   :  { %v25_v6 = vmul.f32 1.442695, %v24_v5 }
  0x96   :  { %69 = vpow2.f32 %v25_v6 }
  0x99   :  { %v18_v9 = vpop.permute.xlu0 %17 }
  0x9a   :  { %vm19_vm1 = vcmp.eq.s32.totalorder %v15_v8, %v18_v9 }
  0x9b   :  { %v33_v11 = vsel %vm19_vm1, %v12_v0, 0.0 }
  0x9c   :  { %v34_v13 = vsel %vm20_vm0, %v33_v11, 0.0 }
  0xa0   :  { %v70_v10 = vpop.eup %69 }
  0xa1   :  { %v27_v12 = vsel %vm20_vm0, %v70_v10, 0.0 }
  0xa2   :  { %28 = vadd.xlane.f32.xlu1 %v27_v12 }
  0xa6   :  { %35 = vadd.xlane.f32.xlu1 %v34_v13 }
 0x12f   :  { %v29_v14 = vpop.xlane.xlu1 %28 }
 0x130   :  { %71 = vlog2.f32 %v29_v14 }
 0x133   :  { %v36_v17 = vpop.xlane.xlu1 %35 }
 0x13a   :  { %v72_v15 = vpop.eup %71 }
 0x13b   :  { %v31_v16 = vmul.f32 0.6931472, %v72_v15 }
 0x13d   :  { %v32_v18 = vadd.f32 %v31_v16, %v23_v4 }
 0x13f   :  { %v37_v19 = vsub.f32 %v32_v18, %v36_v17 }
 0x141   :  { %v38_v20 = vsub.f32 0.0, %v37_v19 }
 0x143   :  { %v39_v21 = vmul.f32 1.442695, %v38_v20 }
 0x145   :  { %73 = vpow2.f32 %v39_v21 }
 0x14f   :  { %v74_v22 = vpop.eup %73 }
 0x150   :  { %v41_v23 = vsub.f32 1.0, %v74_v22 }
 0x152   :  { %v42_v24 = vmul.f32 %v41_v23, %v41_v23 }
 0x154   :  { %v43_v25 = vmul.f32 0.5, %v42_v24 }
 0x156   :  { %v44_v26 = vmul.f32 %v43_v25, %v37_v19 }
 0x158   :  { %v45_v27 = vrot.slane %v44_v26, 4 }
 0x15a   :  { %v46_v28 = vadd.f32 %v45_v27, %v44_v26 }
 0x15c   :  { %v47_v29 = vrot.slane %v46_v28, 2 }
 0x15e   :  { %v48_v30 = vadd.f32 %v47_v29, %v46_v28 }
 0x160   :  { %v49_v31 = vrot.slane %v48_v30, 1 }
 0x162   :  { %v50_v32 = vadd.f32 %v49_v31, %v48_v30 }
 0x164   :  { %51 = vst [vmem:[#allocation2] sm:$0xff] %v50_v32 }
 0x165   :  { %86 = shalt.err (!%p83_p4)
}
 0x166   :  { %s87_s16 = scalar_lea.hbm %s139_s2, 128 }
 0x167   :  { %p88_p5 = scmp.ne.s32.totalorder %s139_s2, %s87_s16  ;;  %p91_p6 = scmp.lt.u32.totalorder %s87_s16, %s139_s2 }
 0x169   :  { %p93_p7 = pnand %p91_p6, %p88_p5 }
 0x16b   :  { %96 = shalt.err (!%p93_p7)
}
 0x16c   :  { %61 = dma.vmem_to_hbm [thread:$0]  %s59_s1, 128, %s139_s2, [#allocation3]  }
 0x16d   :  { %97 = dma.done.wait [#allocation3], 128  }
 0x16e   :  { %98 = vsyncadd [#allocation3], 4294967168 }
 0x16f   :  { %65 = vsyncpa [#allocation3], 1 }

</bundles_post_ra>
